<compile_context>
chip_gen: v7x
topology: tpu7x:2x2x1
jax: 0.10.0
libtpu: 0.0.40
codegen_flags: <defaults>
</compile_context>

<pallas_src>
import functools
import math

import jax
import jax.numpy as jnp
from jax.experimental import pallas as pl
from jax.experimental.pallas import tpu as pltpu


def _sdpa_kernel(q_ref, k_ref, o_ref, *, scale):
    # q_ref: (B, H, Sq, D), k_ref: (B, H, Sk, D), o_ref: (B, H, Sq, D)
    B, H, Sq, D = q_ref.shape
    Sk = k_ref.shape[2]

    # Fold the 1/sqrt(D) scale into q once (replaces per-score divide + "+0").
    q = q_ref[...].astype(jnp.float32) * scale
    k = k_ref[...].astype(jnp.float32)

    # Merge (B, H) into a single batch axis — a leading-dim flatten only, so the
    # minor (sublane, lane) layout is untouched (no relayout cost).
    q = q.reshape(B * H, Sq, D)
    k = k.reshape(B * H, Sk, D)

    # s = q @ k^T per (batch, head): batched contraction over D.
    s = jnp.einsum("bqd,bkd->bqk", q, k, preferred_element_type=jnp.float32)

    # Numerically-stable softmax over the last axis (exact division — the approx
    # EUP reciprocal previously exceeded the 1e-3 tolerance).
    m = jnp.max(s, axis=-1, keepdims=True)
    e = jnp.exp(s - m)
    p = e / jnp.sum(e, axis=-1, keepdims=True)

    # out = softmax(s) @ k
    out = jnp.einsum("bqk,bkd->bqd", p, k, preferred_element_type=jnp.float32)

    o_ref[...] = out.reshape(B, H, Sq, D).astype(o_ref.dtype)


def sdpa_pallas(x1, x2):
    """softmax(x1 @ x2^T / sqrt(D)) @ x2, per (batch, head)."""
    B, H, Sq, D = x1.shape
    B2, H2, Sk, D2 = x2.shape
    assert (B, H, D) == (B2, H2, D2), "batch/head/feature dims must match"

    kernel = functools.partial(_sdpa_kernel, scale=1.0 / math.sqrt(D))

    return pl.pallas_call(
        kernel,
        out_shape=jax.ShapeDtypeStruct((B, H, Sq, D), x1.dtype),
        grid_spec=pltpu.PrefetchScalarGridSpec(
            num_scalar_prefetch=0,
            grid=(1,),  # whole problem in one step; operands easily fit VMEM
            in_specs=[
                pl.BlockSpec((B, H, Sq, D), lambda i: (0, 0, 0, 0)),
                pl.BlockSpec((B, H, Sk, D), lambda i: (0, 0, 0, 0)),
            ],
            out_specs=pl.BlockSpec((B, H, Sq, D), lambda i: (0, 0, 0, 0)),
        ),
        compiler_params=pltpu.CompilerParams(
            dimension_semantics=("arbitrary",),
        ),
    )(x1, x2)


def sdpa_ref(x1, x2):
    d = x1.shape[-1]
    v1 = jnp.einsum("bhqd,bhkd->bhqk", x1, x2)
    v2 = v1 / math.sqrt(d)
    v3 = v2 + 0.0
    v4 = jax.nn.softmax(v3, axis=-1)
    return jnp.einsum("bhqk,bhkd->bhqd", v4, x2)


if __name__ == "__main__":
    # Small, matmul-compatible shapes consistent with the module's forward:
    # x1: (B, H, Sq, D), x2: (B, H, Sk, D).
    B, H, Sq, Sk, D = 2, 4, 16, 16, 32
    key = jax.random.PRNGKey(0)
    k1, k2 = jax.random.split(key)
    x1 = jax.random.normal(k1, (B, H, Sq, D), dtype=jnp.float32)
    x2 = jax.random.normal(k2, (B, H, Sk, D), dtype=jnp.float32)

    out = jax.block_until_ready(sdpa_pallas(x1, x2))

    ref = sdpa_ref(x1, x2)
    assert out.shape == (B, H, Sq, D)
    assert jnp.allclose(out, ref, atol=1e-4, rtol=1e-4)

    print("KERNEL_OK")
</pallas_src>

<mosaic_0001>
module attributes {stable_mosaic.version = 11 : i64} {
  func.func @_sdpa_kernel(%arg0: i32, %arg1: memref<2x4x16x32xf32, #tpu.memory_space<vmem>>, %arg2: memref<2x4x16x32xf32, #tpu.memory_space<vmem>>, %arg3: memref<2x4x16x32xf32, #tpu.memory_space<vmem>>) attributes {dimension_semantics = [#tpu.dimension_semantics<arbitrary>], iteration_bounds = array<i64: 1>, scalar_prefetch = 0 : i64, scratch_operands = 0 : i64, tpu.core_type = #tpu.core_type<tc>, window_params = [{pipeline_mode = #tpu.pipeline_mode<synchronous>, transform_indices = @transform_0, window_bounds = array<i64: 2, 4, 16, 32>}, {pipeline_mode = #tpu.pipeline_mode<synchronous>, transform_indices = @transform_1, window_bounds = array<i64: 2, 4, 16, 32>}, {pipeline_mode = #tpu.pipeline_mode<synchronous>, transform_indices = @transform_2, window_bounds = array<i64: 2, 4, 16, 32>}]} {
    %c0 = arith.constant 0 : index
    %c0_0 = arith.constant 0 : index
    %c0_1 = arith.constant 0 : index
    %c0_2 = arith.constant 0 : index
    %0 = vector.load %arg1[%c0, %c0_0, %c0_1, %c0_2] : memref<2x4x16x32xf32, #tpu.memory_space<vmem>>, vector<2x4x16x32xf32>
    %cst = arith.constant 0.176776692 : f32
    %1 = vector.broadcast %cst : f32 to vector<2x4x16x32xf32>
    %2 = arith.mulf %0, %1 : vector<2x4x16x32xf32>
    %c0_3 = arith.constant 0 : index
    %c0_4 = arith.constant 0 : index
    %c0_5 = arith.constant 0 : index
    %c0_6 = arith.constant 0 : index
    %3 = vector.load %arg2[%c0_3, %c0_4, %c0_5, %c0_6] : memref<2x4x16x32xf32, #tpu.memory_space<vmem>>, vector<2x4x16x32xf32>
    %4 = vector.shape_cast %2 : vector<2x4x16x32xf32> to vector<8x16x32xf32>
    %5 = vector.shape_cast %3 : vector<2x4x16x32xf32> to vector<8x16x32xf32>
    "tpu.trace_start"() <{level = 10 : i32, message = "bqd,bkd->bqk"}> : () -> ()
    %cst_7 = arith.constant dense<0.000000e+00> : vector<8x16x16xf32>
    %6 = tpu.matmul %4, %5, %cst_7 {dimension_numbers = #tpu.dot_dimension_numbers<[2], [2], [1], [1], [0, 0, 0, 1, 1, 1], [0], [0]>} : vector<8x16x32xf32>, vector<8x16x32xf32>, vector<8x16x16xf32> -> vector<8x16x16xf32>
    "tpu.trace_stop"() : () -> ()
    %cst_8 = arith.constant dense<0xFF800000> : vector<8x16xf32>
    %7 = vector.multi_reduction <maximumf>, %6, %cst_8 [2] : vector<8x16x16xf32> to vector<8x16xf32>
    %8 = vector.shape_cast %7 : vector<8x16xf32> to vector<8x16x1xf32>
    %9 = vector.broadcast %8 : vector<8x16x1xf32> to vector<8x16x16xf32>
    %10 = arith.subf %6, %9 : vector<8x16x16xf32>
    %11 = math.exp %10 : vector<8x16x16xf32>
    %cst_9 = arith.constant dense<0.000000e+00> : vector<8x16xf32>
    %12 = vector.multi_reduction <add>, %11, %cst_9 [2] : vector<8x16x16xf32> to vector<8x16xf32>
    %13 = vector.shape_cast %12 : vector<8x16xf32> to vector<8x16x1xf32>
    %14 = vector.broadcast %13 : vector<8x16x1xf32> to vector<8x16x16xf32>
    %15 = arith.divf %11, %14 : vector<8x16x16xf32>
    "tpu.trace_start"() <{level = 10 : i32, message = "bqk,bkd->bqd"}> : () -> ()
    %cst_10 = arith.constant dense<0.000000e+00> : vector<8x16x32xf32>
    %16 = tpu.matmul %15, %5, %cst_10 {dimension_numbers = #tpu.dot_dimension_numbers<[2], [1], [1], [2], [0, 0, 0, 1, 1, 2], [0], [0]>} : vector<8x16x16xf32>, vector<8x16x32xf32>, vector<8x16x32xf32> -> vector<8x16x32xf32>
    "tpu.trace_stop"() : () -> ()
    %17 = vector.shape_cast %16 : vector<8x16x32xf32> to vector<2x4x16x32xf32>
    %c0_11 = arith.constant 0 : index
    %c0_12 = arith.constant 0 : index
    %c0_13 = arith.constant 0 : index
    %c0_14 = arith.constant 0 : index
    %18 = vector.load %arg3[%c0_11, %c0_12, %c0_13, %c0_14] : memref<2x4x16x32xf32, #tpu.memory_space<vmem>>, vector<2x4x16x32xf32>
    tpu.vector_store %arg3[%c0_11, %c0_12, %c0_13, %c0_14], %17 {strides = array<i32>} : memref<2x4x16x32xf32, #tpu.memory_space<vmem>>, vector<2x4x16x32xf32>,
    return
  }
  func.func @transform_0(%arg0: i32) -> (i32, i32, i32, i32) {
    %c0_i32 = arith.constant 0 : i32
    %c0_i32_0 = arith.constant 0 : i32
    %c0_i32_1 = arith.constant 0 : i32
    %c0_i32_2 = arith.constant 0 : i32
    %c0_i32_3 = arith.constant 0 : i32
    return %c0_i32, %c0_i32_0, %c0_i32_1, %c0_i32_2 : i32, i32, i32, i32
  }
  func.func @transform_1(%arg0: i32) -> (i32, i32, i32, i32) {
    %c0_i32 = arith.constant 0 : i32
    %c0_i32_0 = arith.constant 0 : i32
    %c0_i32_1 = arith.constant 0 : i32
    %c0_i32_2 = arith.constant 0 : i32
    %c0_i32_3 = arith.constant 0 : i32
    return %c0_i32, %c0_i32_0, %c0_i32_1, %c0_i32_2 : i32, i32, i32, i32
  }
  func.func @transform_2(%arg0: i32) -> (i32, i32, i32, i32) {
    %c0_i32 = arith.constant 0 : i32
    %c0_i32_0 = arith.constant 0 : i32
    %c0_i32_1 = arith.constant 0 : i32
    %c0_i32_2 = arith.constant 0 : i32
    %c0_i32_3 = arith.constant 0 : i32
    return %c0_i32, %c0_i32_0, %c0_i32_1, %c0_i32_2 : i32, i32, i32, i32
  }
}

</mosaic_0001>

<bundles_post_ra>
// kernel: tpu_custom_call.1
= control target key start
LH: loop header
LB: loop body
LE: loop exit
PB: predicated region body
PF: predicated region fallthrough
CT: control target
= control target key end

     0   :  { %7 = vsyncpa [#allocation3], 0  ;;  %s2420_s0 = inlined_call_operand.hbm [shape: f32[2,4,16,32], index: 0, kind: input, shape index: {}]   ;;  %s2421_s1 = inlined_call_operand.hbm [shape: f32[2,4,16,32], index: 1, kind: input, shape index: {}]   ;;  %s2422_s2 = inlined_call_operand.hbm [shape: f32[2,4,16,32], index: 2, kind: output, shape index: {}]  }
   0x1   :  { %8 = vsyncpa [#allocation6], 0 }
   0x2   :  { %9 = vsyncpa [#allocation4], 0  ;;  %s2089_s9 = smov [#allocation2]   ;;  %s2017_s13 = scalar_lea.hbm %s2420_s0, 2048 }
   0x3   :  { %s15_s10 = sshll.u32 %s2089_s9, 4  ;;  %p2018_p0 = scmp.ne.s32.totalorder %s2420_s0, %s2017_s13  ;;  %s16_s10 = int_to_ptr.vmem [resolvable:$true] %s15_s10 }
   0x4   :  { %p2021_p1 = scmp.lt.u32.totalorder %s2017_s13, %s2420_s0 }
   0x6   :  { %p2023_p2 = pnand %p2021_p1, %p2018_p0 }
   0x8   :  { %2026 = shalt.err (!%p2023_p2)
}
   0x9   :  { %s2027_s18 = scalar_lea.vmem %s16_s10, 2048  ;;  %p2032_p4 = scmp.lt.s32.totalorder %s16_s10, %s16_s10 }
   0xa   :  { %p2028_p3 = scmp.ne.s32.totalorder %s16_s10, %s2027_s18  ;;  %p2033_p5 = scmp.lt.s32.totalorder %s2027_s18, %s2027_s18 }
   0xc   :  { %p2034_p6 = por %p2033_p5, %p2032_p4 }
   0xe   :  { %p2035_p7 = pnand %p2034_p6, %p2028_p3 }
  0x10   :  { %2038 = shalt.err (!%p2035_p7)
}
  0x11   :  { %s2090_s19 = smov 128   ;;  %s2091_s20 = smov 8  }
  0x12   :  { %21 = dma.hbm_to_vmem [thread:$0]  %s2420_s0, 2048, %s16_s10, [#allocation3], %s2090_s19, %s2090_s19, %s2091_s20  }
  0x13   :  { %s2092_s23 = smov [#allocation5]   ;;  %s2039_s27 = scalar_lea.hbm %s2421_s1, 2048 }
  0x14   :  { %s27_s24 = sshll.u32 %s2092_s23, 4  ;;  %p2040_p8 = scmp.ne.s32.totalorder %s2421_s1, %s2039_s27  ;;  %s28_s24 = int_to_ptr.vmem [resolvable:$true] %s27_s24 }
  0x15   :  { %p2043_p9 = scmp.lt.u32.totalorder %s2039_s27, %s2421_s1 }
  0x17   :  { %p2045_p10 = pnand %p2043_p9, %p2040_p8 }
  0x19   :  { %2048 = shalt.err (!%p2045_p10)
}
  0x1a   :  { %s2049_s4 = scalar_lea.vmem %s28_s24, 2048  ;;  %p2054_p12 = scmp.lt.s32.totalorder %s28_s24, %s28_s24 }
  0x1b   :  { %p2050_p11 = scmp.ne.s32.totalorder %s28_s24, %s2049_s4  ;;  %p2055_p13 = scmp.lt.s32.totalorder %s2049_s4, %s2049_s4 }
  0x1d   :  { %p2056_p0 = por %p2055_p13, %p2054_p12 }
  0x1f   :  { %p2057_p1 = pnand %p2056_p0, %p2050_p11 }
  0x21   :  { %2060 = shalt.err (!%p2057_p1)
}
  0x22   :  { %33 = dma.hbm_to_vmem [thread:$0]  %s2421_s1, 2048, %s28_s24, [#allocation6], %s2090_s19, %s2090_s19, %s2091_s20  }
  0x23   :  { %2083 = dma.done.wait [#allocation3], 2048  }
  0x24   :  { %2084 = vsyncadd [#allocation3], 4294965248 }
  0x25   :  { %2085 = dma.done.wait [#allocation6], 2048  }
  0x26   :  { %2086 = vsyncadd [#allocation6], 4294965248  ;;  %vm88_vm0 = vcmask 261120   ;;  %v72_v1 = vld [vmem:[#allocation5] sm:$0xff]  ;;  %v73_v2 = vld [vmem:[#allocation5 + $0x8] sm:$0xff]  ;;  %vm785_vm2 = vcmask 130048  }
  0x27   :  { %vm2141_vm1 = vmpackc.low %vm88_vm0, %vm88_vm0  ;;  %v74_v3 = vld [vmem:[#allocation5 + $0x10] sm:$0xff]  ;;  %v2145_v4 = vpack.c.bf16 %v73_v2, %v72_v1  ;;  %v75_v5 = vld [vmem:[#allocation5 + $0x18] sm:$0xff]  ;;  %s2093_s1 = smov [#allocation7]  }
  0x28   :  { %v40_v6 = vld [vmem:[#allocation2] sm:$0xff]  ;;  %v2147_v7 = vpack.c.bf16 %v75_v5, %v74_v3  ;;  %v42_v9 = vld [vmem:[#allocation2 + $0x10] sm:$0xff]  ;;  %v77_v12 = vld [vmem:[#allocation5 + $0x28] sm:$0xff]  ;;  %s1631_s6 = sshll.u32 %s2093_s1, 4  ;;  %s1632_s6 = int_to_ptr.vmem [resolvable:$true] %s1631_s6 }
  0x29   :  { %v56_v8 = vmul.f32 0.17677669, %v40_v6  ;;  %v76_v10 = vld [vmem:[#allocation5 + $0x20] sm:$0xff]  ;;  %1870 = vmatprep.subr.msk.bf16.mxu0 %vm2141_vm1, %v2145_v4  ;;  %v58_v11 = vmul.f32 0.17677669, %v42_v9  ;;  %v78_v13 = vld [vmem:[#allocation5 + $0x30] sm:$0xff]  ;;  %p2066_p3 = scmp.lt.s32.totalorder %s1632_s6, %s1632_s6 }
  0x2a   :  { %v79_v14 = vld [vmem:[#allocation5 + $0x38] sm:$0xff]  ;;  %1876 = vmatprep.subr.msk.bf16.mxu1 %vm2141_vm1, %v2147_v7  ;;  %1873 = vmatpush3.bf16.xpose.msk.msra.mxu0 %vm2141_vm1, %v2145_v4  ;;  %v41_v15 = vld [vmem:[#allocation2 + $0x8] sm:$0xff]  ;;  %v2158_v16 = vpack.c.bf16 %v77_v12, %v76_v10  ;;  %v46_v19 = vld [vmem:[#allocation2 + $0x30] sm:$0xff]  ;;  %s2061_s7 = scalar_lea.vmem %s1632_s6, 2048 }
  0x2b   :  { %v2160_v17 = vpack.c.bf16 %v79_v14, %v78_v13  ;;  %1879 = vmatpush3.bf16.xpose.msk.msra.mxu1 %vm2141_vm1, %v2147_v7  ;;  %1760 = vmatprep.mubr.msk.f32.mxu0 %vm88_vm0, %v56_v8  ;;  %v43_v18 = vld [vmem:[#allocation2 + $0x18] sm:$0xff]  ;;  %v57_v20 = vmul.f32 0.17677669, %v41_v15  ;;  %v44_v21 = vld [vmem:[#allocation2 + $0x20] sm:$0xff]  ;;  %v81_v23 = vld [vmem:[#allocation5 + $0x48] sm:$0xff]  ;;  %p2062_p2 = scmp.ne.s32.totalorder %s1632_s6, %s2061_s7  ;;  %p2067_p4 = scmp.lt.s32.totalorder %s2061_s7, %s2061_s7 }
  0x2c   :  { %1767 = vmatprep.mubr.msk.f32.mxu1 %vm88_vm0, %v58_v11  ;;  %1882 = vmatprep.subr.msk.bf16.mxu0 %vm2141_vm1, %v2158_v16  ;;  %v80_v22 = vld [vmem:[#allocation5 + $0x40] sm:$0xff]  ;;  %v59_v24 = vmul.f32 0.17677669, %v43_v18  ;;  %v82_v25 = vld [vmem:[#allocation5 + $0x50] sm:$0xff]  ;;  %v83_v26 = vld [vmem:[#allocation5 + $0x58] sm:$0xff] }
  0x2d   :  { %1888 = vmatprep.subr.msk.bf16.mxu1 %vm2141_vm1, %v2160_v17  ;;  %v62_v27 = vmul.f32 0.17677669, %v46_v19  ;;  %v60_v28 = vmul.f32 0.17677669, %v44_v21  ;;  %v2173_v29 = vpack.c.bf16 %v81_v23, %v80_v22  ;;  %v2176_v30 = vpack.c.bf16 %v83_v26, %v82_v25  ;;  %v45_v31 = vld [vmem:[#allocation2 + $0x28] sm:$0xff]  ;;  %v47_v32 = vld [vmem:[#allocation2 + $0x38] sm:$0xff]  ;;  %p2068_p5 = por %p2067_p4, %p2066_p3 }
  0x2e   :  { %v50_v33 = vld [vmem:[#allocation2 + $0x50] sm:$0xff]  ;;  %v61_v34 = vmul.f32 0.17677669, %v45_v31  ;;  %v48_v35 = vld [vmem:[#allocation2 + $0x40] sm:$0xff]  ;;  %v85_v37 = vld [vmem:[#allocation5 + $0x68] sm:$0xff] }
  0x2f   :  { %v84_v36 = vld [vmem:[#allocation5 + $0x60] sm:$0xff]  ;;  %v63_v38 = vmul.f32 0.17677669, %v47_v32  ;;  %v86_v39 = vld [vmem:[#allocation5 + $0x70] sm:$0xff]  ;;  %v87_v40 = vld [vmem:[#allocation5 + $0x78] sm:$0xff]  ;;  %p2069_p6 = pnand %p2068_p5, %p2062_p2 }
  0x30   :  { %v66_v41 = vmul.f32 0.17677669, %v50_v33  ;;  %v64_v42 = vmul.f32 0.17677669, %v48_v35  ;;  %v2193_v43 = vpack.c.bf16 %v85_v37, %v84_v36  ;;  %v2196_v44 = vpack.c.bf16 %v87_v40, %v86_v39  ;;  %v49_v45 = vld [vmem:[#allocation2 + $0x48] sm:$0xff]  ;;  %v51_v46 = vld [vmem:[#allocation2 + $0x58] sm:$0xff] }
  0x31   :  { %1761 = vmatmul.mubr.msk.f32.vlgmr.msra.gmra.mrb[0].mxu0 %vm88_vm0, %v57_v20  ;;  %v52_v47 = vld [vmem:[#allocation2 + $0x60] sm:$0xff]  ;;  %v65_v48 = vmul.f32 0.17677669, %v49_v45  ;;  %v54_v49 = vld [vmem:[#allocation2 + $0x70] sm:$0xff]  ;;  %v67_v50 = vmul.f32 0.17677669, %v51_v46 }
  0x32   :  { %1768 = vmatmul.mubr.msk.f32.vlgmr.msra.gmra.mrb[0].mxu1 %vm88_vm0, %v59_v24  ;;  %1885 = vmatpush3.bf16.xpose.msk.msra.mxu0 %vm2141_vm1, %v2158_v16  ;;  %v68_v51 = vmul.f32 0.17677669, %v52_v47  ;;  %v70_v52 = vmul.f32 0.17677669, %v54_v49  ;;  %v53_v53 = vld [vmem:[#allocation2 + $0x68] sm:$0xff]  ;;  %v55_v54 = vld [vmem:[#allocation2 + $0x78] sm:$0xff] }
  0x33   :  { %1891 = vmatpush3.bf16.xpose.msk.msra.mxu1 %vm2141_vm1, %v2160_v17  ;;  %1781 = vmatprep.mubr.msk.f32.mxu1 %vm88_vm0, %v62_v27  ;;  %v69_v55 = vmul.f32 0.17677669, %v53_v53  ;;  %v71_v56 = vmul.f32 0.17677669, %v55_v54 }
  0x34   :  { %1774 = vmatprep.mubr.msk.f32.mxu0 %vm88_vm0, %v60_v28  ;;  %1894 = vmatprep.subr.msk.bf16.mxu0 %vm2141_vm1, %v2173_v29 }
  0x35   :  { %1900 = vmatprep.subr.msk.bf16.mxu1 %vm2141_vm1, %v2176_v30 }
  0x39   :  { %1775 = vmatmul.mubr.msk.f32.vlgmr.msra.gmra.mrb[2].mxu0 %vm88_vm0, %v61_v34 }
  0x3a   :  { %1782 = vmatmul.mubr.msk.f32.vlgmr.msra.gmra.mrb[2].mxu1 %vm88_vm0, %v63_v38  ;;  %1897 = vmatpush3.bf16.xpose.msk.msra.mxu0 %vm2141_vm1, %v2173_v29 }
  0x3b   :  { %1903 = vmatpush3.bf16.xpose.msk.msra.mxu1 %vm2141_vm1, %v2176_v30  ;;  %1795 = vmatprep.mubr.msk.f32.mxu1 %vm88_vm0, %v66_v41 }
  0x3c   :  { %1788 = vmatprep.mubr.msk.f32.mxu0 %vm88_vm0, %v64_v42  ;;  %1906 = vmatprep.subr.msk.bf16.mxu0 %vm2141_vm1, %v2193_v43 }
  0x3d   :  { %1912 = vmatprep.subr.msk.bf16.mxu1 %vm2141_vm1, %v2196_v44 }
  0x41   :  { %1789 = vmatmul.mubr.msk.f32.vlgmr.msra.gmra.mrb[4].mxu0 %vm88_vm0, %v65_v48 }
  0x42   :  { %1796 = vmatmul.mubr.msk.f32.vlgmr.msra.gmra.mrb[4].mxu1 %vm88_vm0, %v67_v50  ;;  %1909 = vmatpush3.bf16.xpose.msk.msra.mxu0 %vm2141_vm1, %v2193_v43 }
  0x43   :  { %1915 = vmatpush3.bf16.xpose.msk.msra.mxu1 %vm2141_vm1, %v2196_v44  ;;  %1802 = vmatprep.mubr.msk.f32.mxu0 %vm88_vm0, %v68_v51 }
  0x44   :  { %1809 = vmatprep.mubr.msk.f32.mxu1 %vm88_vm0, %v70_v52  ;;  %1917 = vmatprep.subr.bf16.mxu0 %v2145_v4 }
  0x45   :  { %1921 = vmatprep.subr.bf16.mxu1 %v2147_v7 }
  0x49   :  { %1803 = vmatmul.mubr.msk.f32.vlgmr.msra.gmra.mrb[6].mxu0 %vm88_vm0, %v69_v55 }
  0x4a   :  { %1810 = vmatmul.mubr.msk.f32.vlgmr.msra.gmra.mrb[6].mxu1 %vm88_vm0, %v71_v56  ;;  %1919 = vmatpush3.bf16.msra.mxu0 %v2145_v4 }
  0x4b   :  { %1923 = vmatpush3.bf16.msra.mxu1 %v2147_v7  ;;  %1925 = vmatprep.subr.bf16.mxu0 %v2158_v16 }
  0x4c   :  { %1929 = vmatprep.subr.bf16.mxu1 %v2160_v17 }
 0x104   :  { %v1762_v57 = vpop.f32.mrb[0].mxu0 }
 0x105   :  { %v167_v58 = vpop.f32.mrb[1].mxu0  ;;  %v789_v59 = vsel %vm785_vm2, %v1762_v57, -inf  ;;  %v1769_v60 = vpop.f32.mrb[0].mxu1 }
 0x106   :  { %790 = vmax.xlane.f32.xlu1 %v789_v59  ;;  %v786_v61 = vsel %vm785_vm2, %v167_v58, -inf  ;;  %v254_v62 = vpop.f32.mrb[1].mxu1  ;;  %v795_v63 = vsel %vm785_vm2, %v1769_v60, -inf }
 0x107   :  { %787 = vmax.xlane.f32.xlu0 %v786_v61  ;;  %v792_v0 = vsel %vm785_vm2, %v254_v62, -inf }
 0x10a   :  { %796 = vmax.xlane.f32.xlu1 %v795_v63 }
 0x10b   :  { %793 = vmax.xlane.f32.xlu0 %v792_v0 }
 0x10c   :  { %v1776_v1 = vpop.f32.mrb[2].mxu0 }
 0x10d   :  { %v1783_v2 = vpop.f32.mrb[2].mxu1  ;;  %v801_v3 = vsel %vm785_vm2, %v1776_v1, -inf  ;;  %v2236_v4 = vpop.f32.mrb[3].mxu0 }
 0x10e   :  { %v807_v5 = vsel %vm785_vm2, %v1783_v2, -inf  ;;  %v428_v6 = vpop.f32.mrb[3].mxu1  ;;  %v798_v8 = vsel %vm785_vm2, %v2236_v4, -inf }
 0x10f   :  { %808 = vmax.xlane.f32.xlu1 %v807_v5  ;;  %802 = vmax.xlane.f32.xlu0 %v801_v3  ;;  %v804_v7 = vsel %vm785_vm2, %v428_v6, -inf }
 0x113   :  { %805 = vmax.xlane.f32.xlu1 %v804_v7  ;;  %799 = vmax.xlane.f32.xlu0 %v798_v8 }
 0x114   :  { %v2242_v9 = vpop.f32.mrb[4].mxu0 }
 0x115   :  { %v2244_v10 = vpop.f32.mrb[4].mxu1  ;;  %v813_v11 = vsel %vm785_vm2, %v2242_v9, -inf  ;;  %v2248_v12 = vpop.f32.mrb[5].mxu0 }
 0x116   :  { %v819_v13 = vsel %vm785_vm2, %v2244_v10, -inf  ;;  %v2252_v14 = vpop.f32.mrb[5].mxu1  ;;  %v810_v18 = vsel %vm785_vm2, %v2248_v12, -inf }
 0x117   :  { %820 = vmax.xlane.f32.xlu1 %v819_v13  ;;  %814 = vmax.xlane.f32.xlu0 %v813_v11  ;;  %v816_v15 = vsel %vm785_vm2, %v2252_v14, -inf }
 0x11b   :  { %817 = vmax.xlane.f32.xlu1 %v816_v15  ;;  %811 = vmax.xlane.f32.xlu0 %v810_v18 }
 0x11c   :  { %v2258_v19 = vpop.f32.mrb[6].mxu0 }
 0x11d   :  { %v2260_v20 = vpop.f32.mrb[6].mxu1  ;;  %v2262_v21 = vpop.f32.mrb[7].mxu0  ;;  %v825_v25 = vsel %vm785_vm2, %v2258_v19, -inf }
 0x11e   :  { %v2264_v22 = vpop.f32.mrb[7].mxu1  ;;  %v822_v23 = vsel %vm785_vm2, %v2262_v21, -inf  ;;  %v831_v26 = vsel %vm785_vm2, %v2260_v20, -inf }
 0x11f   :  { %v828_v24 = vsel %vm785_vm2, %v2264_v22, -inf  ;;  %823 = vmax.xlane.f32.xlu0 %v822_v23 }
 0x120   :  { %829 = vmax.xlane.f32.xlu1 %v828_v24 }
 0x123   :  { %826 = vmax.xlane.f32.xlu0 %v825_v25 }
 0x124   :  { %832 = vmax.xlane.f32.xlu1 %v831_v26 }
 0x193   :  { %v791_v27 = vpop.xlane.xlu1 %790 }
 0x194   :  { %v835_v28 = vsub.f32 %v1762_v57, %v791_v27  ;;  %v788_v31 = vpop.xlane.xlu0 %787 }
 0x195   :  { %v834_v32 = vsub.f32 %v167_v58, %v788_v31 }
 0x196   :  { %v852_v33 = vmul.f32 1.442695, %v835_v28 }
 0x197   :  { %v850_v34 = vmul.f32 1.442695, %v834_v32  ;;  %v797_v35 = vpop.xlane.xlu1 %796 }
 0x198   :  { %1953 = vpow2.f32 %v852_v33  ;;  %v837_v36 = vsub.f32 %v1769_v60, %v797_v35  ;;  %v794_v37 = vpop.xlane.xlu0 %793 }
 0x199   :  { %v836_v38 = vsub.f32 %v254_v62, %v794_v37  ;;  %1955 = vpow2.f32 %v850_v34 }
 0x19a   :  { %v856_v39 = vmul.f32 1.442695, %v837_v36 }
 0x19b   :  { %v854_v40 = vmul.f32 1.442695, %v836_v38 }
 0x19c   :  { %1957 = vpow2.f32 %v856_v39  ;;  %v809_v41 = vpop.xlane.xlu1 %808  ;;  %v803_v42 = vpop.xlane.xlu0 %802 }
 0x19d   :  { %v841_v45 = vsub.f32 %v1783_v2, %v809_v41  ;;  %v839_v46 = vsub.f32 %v1776_v1, %v803_v42  ;;  %1959 = vpow2.f32 %v854_v40 }
 0x19f   :  { %v864_v47 = vmul.f32 1.442695, %v841_v45  ;;  %v860_v48 = vmul.f32 1.442695, %v839_v46 }
 0x1a0   :  { %v806_v49 = vpop.xlane.xlu1 %805  ;;  %v800_v50 = vpop.xlane.xlu0 %799 }
 0x1a1   :  { %1961 = vpow2.f32 %v864_v47  ;;  %v840_v51 = vsub.f32 %v428_v6, %v806_v49  ;;  %v838_v52 = vsub.f32 %v2236_v4, %v800_v50 }
 0x1a2   :  { %v2275_v53 = vpop.eup %1953  ;;  %1963 = vpow2.f32 %v860_v48 }
 0x1a3   :  { %v862_v54 = vmul.f32 1.442695, %v840_v51  ;;  %v858_v55 = vmul.f32 1.442695, %v838_v52  ;;  %v885_v56 = vsel %vm785_vm2, %v2275_v53, 0.0  ;;  %v2279_v57 = vpop.eup %1955 }
 0x1a4   :  { %v821_v58 = vpop.xlane.xlu1 %820  ;;  %v815_v59 = vpop.xlane.xlu0 %814  ;;  %886 = vadd.xlane.f32.xlu0 %v885_v56  ;;  %v882_v2 = vsel %vm785_vm2, %v2279_v57, 0.0 }
 0x1a5   :  { %1965 = vpow2.f32 %v862_v54  ;;  %v845_v60 = vsub.f32 %v2244_v10, %v821_v58  ;;  %v843_v61 = vsub.f32 %v2242_v9, %v815_v59 }
 0x1a6   :  { %v2283_v62 = vpop.eup %1957  ;;  %1967 = vpow2.f32 %v858_v55 }
 0x1a7   :  { %v872_v63 = vmul.f32 1.442695, %v845_v60  ;;  %v868_v0 = vmul.f32 1.442695, %v843_v61  ;;  %v891_v1 = vsel %vm785_vm2, %v2283_v62, 0.0  ;;  %v2289_v3 = vpop.eup %1959 }
 0x1a8   :  { %v818_v4 = vpop.xlane.xlu1 %817  ;;  %892 = vadd.xlane.f32.xlu1 %v891_v1  ;;  %v812_v5 = vpop.xlane.xlu0 %811  ;;  %883 = vadd.xlane.f32.xlu0 %v882_v2  ;;  %v888_v11 = vsel %vm785_vm2, %v2289_v3, 0.0 }
 0x1a9   :  { %1969 = vpow2.f32 %v872_v63  ;;  %v844_v6 = vsub.f32 %v2252_v14, %v818_v4  ;;  %v842_v7 = vsub.f32 %v2248_v12, %v812_v5 }
 0x1aa   :  { %1971 = vpow2.f32 %v868_v0 }
 0x1ab   :  { %v2293_v8 = vpop.eup %1961  ;;  %v870_v9 = vmul.f32 1.442695, %v844_v6  ;;  %v866_v10 = vmul.f32 1.442695, %v842_v7 }
 0x1ac   :  { %v2297_v13 = vpop.eup %1963  ;;  %889 = vadd.xlane.f32.xlu1 %v888_v11  ;;  %v824_v15 = vpop.xlane.xlu0 %823  ;;  %v903_v26 = vsel %vm785_vm2, %v2293_v8, 0.0 }
 0x1ad   :  { %1973 = vpow2.f32 %v870_v9  ;;  %v830_v18 = vpop.xlane.xlu1 %829  ;;  %v846_v23 = vsub.f32 %v2262_v21, %v824_v15  ;;  %v897_v14 = vsel %vm785_vm2, %v2297_v13, 0.0 }
 0x1ae   :  { %1975 = vpow2.f32 %v866_v10  ;;  %v848_v12 = vsub.f32 %v2264_v22, %v830_v18  ;;  %898 = vadd.xlane.f32.xlu0 %v897_v14 }
 0x1af   :  { %v2303_v24 = vpop.eup %1965  ;;  %v874_v25 = vmul.f32 1.442695, %v846_v23 }
 0x1b0   :  { %v2307_v27 = vpop.eup %1967  ;;  %v878_v28 = vmul.f32 1.442695, %v848_v12  ;;  %904 = vadd.xlane.f32.xlu1 %v903_v26  ;;  %v827_v31 = vpop.xlane.xlu0 %826  ;;  %v900_v36 = vsel %vm785_vm2, %v2303_v24, 0.0 }
 0x1b1   :  { %1977 = vpow2.f32 %v874_v25  ;;  %v833_v21 = vpop.xlane.xlu1 %832  ;;  %v847_v32 = vsub.f32 %v2258_v19, %v827_v31  ;;  %v894_v33 = vsel %vm785_vm2, %v2307_v27, 0.0 }
 0x1b2   :  { %1979 = vpow2.f32 %v878_v28  ;;  %v849_v22 = vsub.f32 %v2260_v20, %v833_v21  ;;  %895 = vadd.xlane.f32.xlu0 %v894_v33 }
 0x1b3   :  { %v2313_v34 = vpop.eup %1969  ;;  %v876_v35 = vmul.f32 1.442695, %v847_v32 }
 0x1b4   :  { %v2317_v37 = vpop.eup %1971  ;;  %v880_v38 = vmul.f32 1.442695, %v849_v22  ;;  %901 = vadd.xlane.f32.xlu1 %v900_v36  ;;  %v915_v20 = vsel %vm785_vm2, %v2313_v34, 0.0 }
 0x1b5   :  { %1981 = vpow2.f32 %v876_v35  ;;  %v909_v19 = vsel %vm785_vm2, %v2317_v37, 0.0 }
 0x1b6   :  { %1983 = vpow2.f32 %v880_v38  ;;  %910 = vadd.xlane.f32.xlu0 %v909_v19 }
 0x1b7   :  { %v2321_v39 = vpop.eup %1973 }
 0x1b8   :  { %v2325_v40 = vpop.eup %1975  ;;  %916 = vadd.xlane.f32.xlu1 %v915_v20  ;;  %v912_v45 = vsel %vm785_vm2, %v2321_v39, 0.0 }
 0x1b9   :  { %v906_v41 = vsel %vm785_vm2, %v2325_v40, 0.0 }
 0x1ba   :  { %907 = vadd.xlane.f32.xlu0 %v906_v41 }
 0x1bb   :  { %v2329_v42 = vpop.eup %1977 }
 0x1bc   :  { %v2333_v46 = vpop.eup %1979  ;;  %913 = vadd.xlane.f32.xlu1 %v912_v45  ;;  %v918_v47 = vsel %vm785_vm2, %v2329_v42, 0.0 }
 0x1bd   :  { %v924_v49 = vsel %vm785_vm2, %v2333_v46, 0.0 }
 0x1be   :  { %919 = vadd.xlane.f32.xlu0 %v918_v47 }
 0x1bf   :  { %v2337_v48 = vpop.eup %1981 }
 0x1c0   :  { %v2341_v50 = vpop.eup %1983  ;;  %925 = vadd.xlane.f32.xlu1 %v924_v49  ;;  %v921_v51 = vsel %vm785_vm2, %v2337_v48, 0.0 }
 0x1c1   :  { %v927_v52 = vsel %vm785_vm2, %v2341_v50, 0.0 }
 0x1c2   :  { %922 = vadd.xlane.f32.xlu0 %v921_v51 }
 0x1c4   :  { %928 = vadd.xlane.f32.xlu1 %v927_v52 }
 0x231   :  { %v887_v54 = vpop.xlane.xlu0 %886 }
 0x232   :  { %1985 = vrcp.f32 %v887_v54 }
 0x235   :  { %v893_v55 = vpop.xlane.xlu1 %892  ;;  %v884_v56 = vpop.xlane.xlu0 %883 }
 0x236   :  { %1987 = vrcp.f32 %v884_v56 }
 0x237   :  { %1989 = vrcp.f32 %v893_v55 }
 0x239   :  { %v890_v58 = vpop.xlane.xlu1 %889 }
 0x23a   :  { %1991 = vrcp.f32 %v890_v58 }
 0x23b   :  { %v899_v59 = vpop.xlane.xlu0 %898 }
 0x23c   :  { %1993 = vrcp.f32 %v899_v59  ;;  %v1986_v63 = vpop.eup %1985 }
 0x23d   :  { %v905_v60 = vpop.xlane.xlu1 %904  ;;  %v933_v5 = vmul.f32 %v1986_v63, %v2275_v53 }
 0x23f   :  { %v896_v61 = vpop.xlane.xlu0 %895 }
 0x240   :  { %1995 = vrcp.f32 %v896_v61  ;;  %v1988_v0 = vpop.eup %1987 }
 0x241   :  { %1997 = vrcp.f32 %v905_v60  ;;  %v902_v1 = vpop.xlane.xlu1 %901  ;;  %v931_v2 = vmul.f32 %v1988_v0, %v2279_v57  ;;  %v1990_v4 = vpop.eup %1989 }
 0x242   :  { %1999 = vrcp.f32 %v902_v1  ;;  %v937_v11 = vmul.f32 %v1990_v4, %v2283_v62 }
 0x243   :  { %v911_v6 = vpop.xlane.xlu0 %910  ;;  %1816 = vmatprep.mubr.msk.f32.mxu0 %vm785_vm2, %v931_v2 }
 0x244   :  { %v1992_v7 = vpop.eup %1991  ;;  %1817 = vmatmul.mubr.msk.f32.vlgmr.msra.gmra.mrb[8].mxu0 %vm785_vm2, %v933_v5  ;;  %2001 = vrcp.f32 %v911_v6 }
 0x245   :  { %v917_v9 = vpop.xlane.xlu1 %916  ;;  %v935_v10 = vmul.f32 %v1992_v7, %v2289_v3  ;;  %1927 = vmatpush3.bf16.msra.mxu0 %v2158_v16 }
 0x246   :  { %1933 = vmatprep.subr.bf16.mxu0 %v2173_v29  ;;  %v1994_v53 = vpop.eup %1993 }
 0x247   :  { %v908_v15 = vpop.xlane.xlu0 %907  ;;  %1823 = vmatprep.mubr.msk.f32.mxu1 %vm785_vm2, %v935_v10  ;;  %v941_v14 = vmul.f32 %v1994_v53, %v2297_v13 }
 0x248   :  { %2003 = vrcp.f32 %v908_v15  ;;  %1824 = vmatmul.mubr.msk.f32.vlgmr.msra.gmra.mrb[8].mxu1 %vm785_vm2, %v937_v11 }
 0x249   :  { %2005 = vrcp.f32 %v917_v9  ;;  %v914_v57 = vpop.xlane.xlu1 %913  ;;  %1931 = vmatpush3.bf16.msra.mxu1 %v2160_v17 }
 0x24a   :  { %v1996_v18 = vpop.eup %1995  ;;  %2007 = vrcp.f32 %v914_v57  ;;  %1937 = vmatprep.subr.bf16.mxu1 %v2176_v30 }
 0x24b   :  { %v1998_v62 = vpop.eup %1997  ;;  %v920_v16 = vpop.xlane.xlu0 %919  ;;  %v939_v3 = vmul.f32 %v1996_v18, %v2307_v27 }
 0x24c   :  { %v2000_v23 = vpop.eup %1999  ;;  %2009 = vrcp.f32 %v920_v16  ;;  %v945_v26 = vmul.f32 %v1998_v62, %v2293_v8 }
 0x24d   :  { %1830 = vmatprep.mubr.msk.f32.mxu0 %vm785_vm2, %v939_v3  ;;  %v926_v12 = vpop.xlane.xlu1 %925  ;;  %v943_v25 = vmul.f32 %v2000_v23, %v2303_v24 }
 0x24e   :  { %2011 = vrcp.f32 %v926_v12  ;;  %1831 = vmatmul.mubr.msk.f32.vlgmr.msra.gmra.mrb[10].mxu0 %vm785_vm2, %v941_v14  ;;  %v2002_v13 = vpop.eup %2001 }
 0x24f   :  { %v923_v17 = vpop.xlane.xlu0 %922  ;;  %1837 = vmatprep.mubr.msk.f32.mxu1 %vm785_vm2, %v943_v25  ;;  %1935 = vmatpush3.bf16.msra.mxu0 %v2173_v29  ;;  %v949_v21 = vmul.f32 %v2002_v13, %v2317_v37 }
 0x250   :  { %2013 = vrcp.f32 %v923_v17  ;;  %1838 = vmatmul.mubr.msk.f32.vlgmr.msra.gmra.mrb[10].mxu1 %vm785_vm2, %v945_v26  ;;  %1941 = vmatprep.subr.bf16.mxu0 %v2193_v43 }
 0x251   :  { %v929_v27 = vpop.xlane.xlu1 %928  ;;  %1939 = vmatpush3.bf16.msra.mxu1 %v2176_v30 }
 0x252   :  { %v2004_v24 = vpop.eup %2003  ;;  %2015 = vrcp.f32 %v929_v27  ;;  %1945 = vmatprep.subr.bf16.mxu1 %v2196_v44 }
 0x253   :  { %v2006_v8 = vpop.eup %2005  ;;  %v947_v28 = vmul.f32 %v2004_v24, %v2325_v40 }
 0x254   :  { %v2008_v31 = vpop.eup %2007  ;;  %v953_v33 = vmul.f32 %v2006_v8, %v2313_v34 }
 0x255   :  { %1844 = vmatprep.mubr.msk.f32.mxu0 %vm785_vm2, %v947_v28  ;;  %v951_v29 = vmul.f32 %v2008_v31, %v2321_v39 }
 0x256   :  { %v2010_v32 = vpop.eup %2009  ;;  %1845 = vmatmul.mubr.msk.f32.vlgmr.msra.gmra.mrb[12].mxu0 %vm785_vm2, %v949_v21 }
 0x257   :  { %1851 = vmatprep.mubr.msk.f32.mxu1 %vm785_vm2, %v951_v29  ;;  %v955_v30 = vmul.f32 %v2010_v32, %v2329_v42  ;;  %1943 = vmatpush3.bf16.msra.mxu0 %v2193_v43 }
 0x258   :  { %v2012_v22 = vpop.eup %2011  ;;  %1852 = vmatmul.mubr.msk.f32.vlgmr.msra.gmra.mrb[12].mxu1 %vm785_vm2, %v953_v33 }
 0x259   :  { %1858 = vmatprep.mubr.msk.f32.mxu0 %vm785_vm2, %v955_v30  ;;  %1947 = vmatpush3.bf16.msra.mxu1 %v2196_v44  ;;  %v959_v35 = vmul.f32 %v2012_v22, %v2333_v46 }
 0x25a   :  { %v2014_v36 = vpop.eup %2013 }
 0x25b   :  { %v957_v34 = vmul.f32 %v2014_v36, %v2337_v48  ;;  %1865 = vmatprep.mubr.msk.f32.mxu1 %vm785_vm2, %v959_v35 }
 0x25c   :  { %v2016_v37 = vpop.eup %2015 }
 0x25d   :  { %v961_v38 = vmul.f32 %v2016_v37, %v2341_v50  ;;  %1859 = vmatmul.mubr.msk.f32.vlgmr.msra.gmra.mrb[14].mxu0 %vm785_vm2, %v957_v34 }
 0x25f   :  { %1866 = vmatmul.mubr.msk.f32.vlgmr.msra.gmra.mrb[14].mxu1 %vm785_vm2, %v961_v38 }
 0x317   :  { %v1818_v43 = vpop.f32.mrb[8].mxu0 }
 0x318   :  { %1611 = vst.msk [vmem:[#allocation7 + $0x8] sm:$0xff] %vm88_vm0, %v1818_v43  ;;  %v1034_v19 = vpop.f32.mrb[9].mxu0 }
 0x319   :  { %1610 = vst.msk [vmem:[#allocation7] sm:$0xff] %vm88_vm0, %v1034_v19 }
 0x31b   :  { %v1825_v44 = vpop.f32.mrb[8].mxu1 }
 0x31c   :  { %1613 = vst.msk [vmem:[#allocation7 + $0x18] sm:$0xff] %vm88_vm0, %v1825_v44  ;;  %v1115_v39 = vpop.f32.mrb[9].mxu1 }
 0x31d   :  { %1612 = vst.msk [vmem:[#allocation7 + $0x10] sm:$0xff] %vm88_vm0, %v1115_v39 }
 0x321   :  { %v1832_v20 = vpop.f32.mrb[10].mxu0 }
 0x322   :  { %1615 = vst.msk [vmem:[#allocation7 + $0x28] sm:$0xff] %vm88_vm0, %v1832_v20  ;;  %v1196_v40 = vpop.f32.mrb[11].mxu0 }
 0x323   :  { %1614 = vst.msk [vmem:[#allocation7 + $0x20] sm:$0xff] %vm88_vm0, %v1196_v40  ;;  %v1839_v41 = vpop.f32.mrb[10].mxu1 }
 0x324   :  { %1617 = vst.msk [vmem:[#allocation7 + $0x38] sm:$0xff] %vm88_vm0, %v1839_v41  ;;  %v1277_v42 = vpop.f32.mrb[11].mxu1 }
 0x325   :  { %1616 = vst.msk [vmem:[#allocation7 + $0x30] sm:$0xff] %vm88_vm0, %v1277_v42 }
 0x329   :  { %v1846_v45 = vpop.f32.mrb[12].mxu0 }
 0x32a   :  { %1619 = vst.msk [vmem:[#allocation7 + $0x48] sm:$0xff] %vm88_vm0, %v1846_v45  ;;  %v1358_v46 = vpop.f32.mrb[13].mxu0 }
 0x32b   :  { %1618 = vst.msk [vmem:[#allocation7 + $0x40] sm:$0xff] %vm88_vm0, %v1358_v46  ;;  %v1853_v47 = vpop.f32.mrb[12].mxu1 }
 0x32c   :  { %1621 = vst.msk [vmem:[#allocation7 + $0x58] sm:$0xff] %vm88_vm0, %v1853_v47  ;;  %v1439_v48 = vpop.f32.mrb[13].mxu1 }
 0x32d   :  { %1620 = vst.msk [vmem:[#allocation7 + $0x50] sm:$0xff] %vm88_vm0, %v1439_v48 }
 0x330   :  { %v1860_v49 = vpop.f32.mrb[14].mxu0 }
 0x331   :  { %1623 = vst.msk [vmem:[#allocation7 + $0x68] sm:$0xff] %vm88_vm0, %v1860_v49  ;;  %v1520_v50 = vpop.f32.mrb[15].mxu0 }
 0x332   :  { %1622 = vst.msk [vmem:[#allocation7 + $0x60] sm:$0xff] %vm88_vm0, %v1520_v50  ;;  %v1867_v51 = vpop.f32.mrb[14].mxu1 }
 0x333   :  { %1625 = vst.msk [vmem:[#allocation7 + $0x78] sm:$0xff] %vm88_vm0, %v1867_v51  ;;  %v1601_v52 = vpop.f32.mrb[15].mxu1 }
 0x334   :  { %1624 = vst.msk [vmem:[#allocation7 + $0x70] sm:$0xff] %vm88_vm0, %v1601_v52 }
 0x335   :  { %2072 = shalt.err (!%p2069_p6)
}
 0x336   :  { %s2073_s10 = scalar_lea.hbm %s2422_s2, 2048 }
 0x337   :  { %p2074_p7 = scmp.ne.s32.totalorder %s2422_s2, %s2073_s10  ;;  %p2077_p8 = scmp.lt.u32.totalorder %s2073_s10, %s2422_s2 }
 0x339   :  { %p2079_p9 = pnand %p2077_p8, %p2074_p7 }
 0x33b   :  { %2082 = shalt.err (!%p2079_p9)
}
 0x33c   :  { %1637 = dma.vmem_to_hbm [thread:$0]  %s1632_s6, 2048, %s2422_s2, [#allocation4], %s2090_s19, %s2090_s19, %s2091_s20  }
 0x33d   :  { %2087 = dma.done.wait [#allocation4], 2048  }
 0x33e   :  { %2088 = vsyncadd [#allocation4], 4294965248 }
 0x33f   :  { %1641 = vsyncpa [#allocation3], 1 }
 0x340   :  { %1642 = vsyncpa [#allocation6], 1 }
 0x341   :  { %1643 = vsyncpa [#allocation4], 1 }

</bundles_post_ra>
